<compile_context>
chip_gen: v7x
topology: tpu7x:2x2x1
jax: 0.10.0
libtpu: 0.0.40
codegen_flags: <defaults>
</compile_context>

<pallas_src>
import functools

import jax
import jax.numpy as jnp
from jax.experimental import pallas as pl
from jax.experimental.pallas import tpu as pltpu

_LANE = 128
_SUBLANE = 8
_VPU_TAIL_MAX_C = 8          # per-class VPU reduce instead of MXU up to here


def _round_up(n, m):
    return ((n + m - 1) // m) * m


def _itemsize(dt):
    return jnp.dtype(dt).itemsize


def _padded_bytes(rows, cols, itemsize):
    """VMEM footprint of one (rows, cols) buffer after (8,128) tile padding."""
    return (_round_up(max(int(rows), 1), _SUBLANE)
            * _round_up(max(int(cols), 1), _LANE) * itemsize)


def _spec(shape, index_map, buffers=None):
    """BlockSpec with optional explicit buffer count; falls back cleanly if
    the running JAX version does not expose pipeline_mode / pl.Buffered."""
    if buffers is None:
        return pl.BlockSpec(shape, index_map)
    try:
        return pl.BlockSpec(shape, index_map, pipeline_mode=pl.Buffered(buffers))
    except Exception:
        return pl.BlockSpec(shape, index_map)


def _vmem_capacity_bytes():
    try:
        return int(pltpu.get_tpu_info().vmem_capacity_bytes)
    except Exception:
        return 128 << 20     # assume a v5e/v6e-class part if the query fails


def _attn_net_kernel(x_ref, w1_ref, b1_ref, w2_ref, b2_ref, a_ref, *,
                     compute_dtype, n_classes, vpu_tail):
    # x_ref : (TM, L)  [input dtype]       w1_ref : (L, D) [compute_dtype]
    # b1_ref: (1, D) f32
    # vpu_tail: w2_ref : (C, D) f32        else: w2_ref : (D, C) [compute_dtype]
    # b2_ref: (1, C) f32                   a_ref : (TM, C)
    prec = (jax.lax.Precision.HIGHEST
            if jnp.dtype(compute_dtype) == jnp.dtype(jnp.float32)
            else jax.lax.Precision.DEFAULT)

    x = x_ref[...]
    if x.dtype != jnp.dtype(compute_dtype):
        x = x.astype(compute_dtype)          # no-op when x is already bf16

    h = jnp.dot(x, w1_ref[...], preferred_element_type=jnp.float32,
                precision=prec)
    h = jnp.tanh(h + b1_ref[...])            # (TM, D) f32, tanh on the EUP

    if vpu_tail:
        # Small n_classes: per-class VPU multiply + lane reduction.  Keeps the
        # MXU free and avoids the (TM, D) low-precision cast temp; w2 stays f32.
        w2 = w2_ref[...]                     # (C, D) f32
        if n_classes == 1:
            a = jnp.sum(h * w2, axis=-1, keepdims=True)
        else:
            col_id = jax.lax.broadcasted_iota(jnp.int32, (1, n_classes), 1)
            a = jnp.zeros((h.shape[0], n_classes), jnp.float32)
            for c in range(n_classes):
                col = jnp.sum(h * w2[c:c + 1, :], axis=-1, keepdims=True)
                a = a + jnp.where(col_id == c, col, 0.0)
        a = a + b2_ref[...]
    else:
        # Many classes: MXU pass (h cast to compute_dtype slightly loosens
        # precision vs the reference; covered by the test tolerances).
        a = jnp.dot(h.astype(compute_dtype), w2_ref[...],
                    preferred_element_type=jnp.float32,
                    precision=prec) + b2_ref[...]

    a_ref[...] = a.astype(a_ref.dtype)


def attn_net_forward(x, w1, b1, w2, b2, *, tm=2048,
                     compute_dtype=jnp.bfloat16,
                     x_buffers=2, weight_buffers=None):
    """Pallas implementation of Attn_Net.forward.  Returns (A, x).

    x           : (N, L).  If the producer already emits bf16, pass it as bf16
                  (kernel streams it as-is); do NOT pre-cast f32 x just for this.
    tm          : rows of x per grid step (main knob).  Auto-shrunk to fit the
                  generation-aware VMEM budget and to give >= 2 grid steps.
    x_buffers   : 3 hides exposed DMA at step boundaries (profile first).
    weight_buffers: None = auto (single-buffer resident weights on v7x-class
                  parts with <= 96 MiB VMEM, default pipelining elsewhere).
    """
    N, L = x.shape
    D = w1.shape[1]
    C = w2.shape[1]
    out_dtype = x.dtype

    vpu_tail = C <= _VPU_TAIL_MAX_C

    w1c = w1.astype(compute_dtype)
    b1_2d = b1.reshape(1, D).astype(jnp.float32)
    b2_2d = b2.reshape(1, C).astype(jnp.float32)
    if vpu_tail:
        w2_arg = jnp.transpose(w2).astype(jnp.float32)   # (C, D), kept f32
        w2_shape, w2_isz = (C, D), 4
    else:
        w2_arg = w2.astype(compute_dtype)                # (D, C)
        w2_shape, w2_isz = (D, C), _itemsize(compute_dtype)

    # --- generation-aware VMEM budget -------------------------------------
    vmem_cap = _vmem_capacity_bytes()
    vmem_budget = max(16 << 20, int(vmem_cap * 0.60))    # ~38 MiB on v7x (64 MiB/TC)
    if weight_buffers is None and vmem_cap <= (96 << 20):
        weight_buffers = 1            # v7x-class part: don't double-buffer weights
    wb = 2 if weight_buffers is None else int(weight_buffers)
    xb = 2 if x_buffers is None else int(x_buffers)
    x_pipe = None if xb == 2 else xb

    x_isz = _itemsize(x.dtype)
    c_isz = _itemsize(compute_dtype)
    o_isz = _itemsize(out_dtype)

    def est_bytes(t):
        est = xb * _padded_bytes(t, L, x_isz)            # streamed x tiles
        est += 2 * _padded_bytes(t, C, o_isz)            # output (lane-padded to 128)
        est += wb * _padded_bytes(L, D, c_isz)           # W1 (resident)
        est += wb * _padded_bytes(1, D, 4)               # b1 (pads to (8,128) tiles)
        est += wb * _padded_bytes(w2_shape[0], w2_shape[1], w2_isz)
        est += wb * _padded_bytes(1, C, 4)               # b2
        # in-kernel temporaries
        if jnp.dtype(x.dtype) != jnp.dtype(compute_dtype):
            est += _padded_bytes(t, L, c_isz)            # x cast temp
        est += 2 * _padded_bytes(t, D, 4)                # h (f32) temporaries
        if not vpu_tail:
            est += _padded_bytes(t, D, c_isz)            # h cast for 2nd matmul
        est += _padded_bytes(t, C, 4)                    # f32 output temp
        return est

    # --- row tile selection -------------------------------------------------
    tm_eff = max(_SUBLANE, min(_round_up(tm, _SUBLANE), _round_up(N, _SUBLANE)))
    if N > _SUBLANE:
        # Guarantee >= 2 grid steps so both v7x TensorCores get work.
        tm_eff = min(tm_eff, max(_SUBLANE, _round_up((N + 1) // 2, _SUBLANE)))
    while tm_eff > _SUBLANE and est_bytes(tm_eff) > vmem_budget:
        tm_eff = max(_SUBLANE, _round_up(tm_eff // 2, _SUBLANE))

    grid = (pl.cdiv(N, tm_eff),)              # masked tail handles N % tm_eff != 0
    vmem_limit = min(est_bytes(tm_eff) + (4 << 20), vmem_budget)
    vmem_limit = max(vmem_limit, est_bytes(tm_eff))      # never below the estimate

    cost = pl.CostEstimate(
        flops=2 * N * L * D + 2 * N * D * C,
        transcendentals=N * D,
        bytes_accessed=N * L * x_isz + L * D * c_isz + N * C * o_isz,
    )

    kernel = functools.partial(_attn_net_kernel,
                               compute_dtype=compute_dtype,
                               n_classes=C,
                               vpu_tail=vpu_tail)

    a = pl.pallas_call(
        kernel,
        out_shape=jax.ShapeDtypeStruct((N, C), out_dtype),
        grid_spec=pltpu.PrefetchScalarGridSpec(
            num_scalar_prefetch=0,
            grid=grid,
            in_specs=[
                _spec((tm_eff, L), lambda i: (i, 0), x_pipe),       # x (streamed)
                _spec((L, D), lambda i: (0, 0), weight_buffers),    # W1 (resident)
                _spec((1, D), lambda i: (0, 0), weight_buffers),    # b1
                _spec(w2_shape, lambda i: (0, 0), weight_buffers),  # W2
                _spec((1, C), lambda i: (0, 0), weight_buffers),    # b2
            ],
            out_specs=pl.BlockSpec((tm_eff, C), lambda i: (i, 0)),
        ),
        compiler_params=pltpu.CompilerParams(
            dimension_semantics=("parallel",),
            vmem_limit_bytes=int(vmem_limit),
        ),
        cost_estimate=cost,
    )(x, w1c, b1_2d, w2_arg, b2_2d)

    # Matches torch: forward(x) -> (module(x), x)
    return a, x


def attn_net_reference(x, w1, b1, w2, b2):
    h = jnp.tanh(jnp.dot(x, w1, precision=jax.lax.Precision.HIGHEST) + b1)
    return jnp.dot(h, w2, precision=jax.lax.Precision.HIGHEST) + b2


def _init_linear_params(key, fan_in, fan_out, dtype=jnp.float32):
    # Deterministic synthetic init (torch-default-like uniform bound).
    kw, kb = jax.random.split(key)
    bound = 1.0 / (fan_in ** 0.5)
    w = jax.random.uniform(kw, (fan_in, fan_out), dtype, -bound, bound)  # [in, out]
    b = jax.random.uniform(kb, (fan_out,), dtype, -bound, bound)
    return w, b


if __name__ == "__main__":
    # Module defaults are L=1024, D=256, n_classes=1 -- shrunk for the test.
    L, D = 128, 128
    key = jax.random.PRNGKey(0)
    k1, k2, k3, k4, kx1, kx2, kx3, kx4 = jax.random.split(key, 8)

    w1, b1 = _init_linear_params(k1, L, D)     # nn.Linear(L, D)
    w2, b2 = _init_linear_params(k2, D, 1)     # nn.Linear(D, n_classes=1)
    # TODO(synk): dropout=True path (nn.Dropout(0.25)) omitted; inference no-op anyway.

    # --- check 1: f32 compute path, tight parity with the reference ----------
    x = jax.random.normal(kx1, (16, L), jnp.float32)
    a, x_out = attn_net_forward(x, w1, b1, w2, b2, compute_dtype=jnp.float32)
    jax.block_until_ready(a)
    jax.block_until_ready(x_out)
    ref = attn_net_reference(x, w1, b1, w2, b2)
    assert a.shape == (16, 1) and x_out.shape == x.shape
    assert (x_out == x).all(), "second output must be the unchanged input"
    assert jnp.allclose(a, ref, atol=5e-5, rtol=5e-4), "f32 path mismatch"

    # --- check 2: bf16 *input* stream + bf16 compute, masked tail (N % tm) ---
    x32 = jax.random.normal(kx2, (300, L), jnp.float32)
    x16 = x32.astype(jnp.bfloat16)             # producer already emits bf16
    a, _ = attn_net_forward(x16, w1, b1, w2, b2, tm=128)
    jax.block_until_ready(a)
    ref = attn_net_reference(x16.astype(jnp.float32), w1, b1, w2, b2)
    assert a.shape == (300, 1)
    assert jnp.allclose(a.astype(jnp.float32), ref, atol=5e-2, rtol=5e-2), \
        "bf16-input tail path mismatch"

    # --- check 3: small n_classes > 1 exercises the extended VPU tail --------
    w2s, b2s = _init_linear_params(k3, D, 4)
    x = jax.random.normal(kx3, (64, L), jnp.float32)
    a, _ = attn_net_forward(x, w1, b1, w2s, b2s)
    jax.block_until_ready(a)
    ref = attn_net_reference(x, w1, b1, w2s, b2s)
    assert a.shape == (64, 4)
    assert jnp.allclose(a, ref, atol=5e-2, rtol=5e-2), "small-C VPU path mismatch"

    # --- check 4: n_classes > 8 exercises the MXU second-matmul path ---------
    w2m, b2m = _init_linear_params(k4, D, 16)
    x = jax.random.normal(kx4, (64, L), jnp.float32)
    a, _ = attn_net_forward(x, w1, b1, w2m, b2m)
    jax.block_until_ready(a)
    ref = attn_net_reference(x, w1, b1, w2m, b2m)
    assert a.shape == (64, 16)
    assert jnp.allclose(a, ref, atol=5e-2, rtol=5e-2), "multi-class MXU path mismatch"

    print("KERNEL_OK")
</pallas_src>

<mosaic_0001>
module attributes {stable_mosaic.version = 11 : i64} {
  func.func @_attn_net_kernel(%arg0: i32, %arg1: memref<8x128xf32, #tpu.memory_space<vmem>>, %arg2: memref<128x128xf32, #tpu.memory_space<vmem>>, %arg3: memref<1x128xf32, #tpu.memory_space<vmem>>, %arg4: memref<1x128xf32, #tpu.memory_space<vmem>>, %arg5: memref<1x1xf32, #tpu.memory_space<vmem>>, %arg6: memref<8x1xf32, #tpu.memory_space<vmem>>) attributes {dimension_semantics = [#tpu.dimension_semantics<parallel>], iteration_bounds = array<i64: 2>, scalar_prefetch = 0 : i64, scratch_operands = 0 : i64, tpu.core_type = #tpu.core_type<tc>, window_params = [{transform_indices = @transform_0, window_bounds = array<i64: 8, 128>}, {pipeline_mode = #tpu.pipeline_mode<synchronous>, transform_indices = @transform_1, window_bounds = array<i64: 128, 128>}, {pipeline_mode = #tpu.pipeline_mode<synchronous>, transform_indices = @transform_2, window_bounds = array<i64: 1, 128>}, {pipeline_mode = #tpu.pipeline_mode<synchronous>, transform_indices = @transform_3, window_bounds = array<i64: 1, 128>}, {pipeline_mode = #tpu.pipeline_mode<synchronous>, transform_indices = @transform_4, window_bounds = array<i64: 1, 1>}, {transform_indices = @transform_5, window_bounds = array<i64: 8, 1>}]} {
    %c0 = arith.constant 0 : index
    %c0_0 = arith.constant 0 : index
    %0 = vector.load %arg1[%c0, %c0_0] : memref<8x128xf32, #tpu.memory_space<vmem>>, vector<8x128xf32>
    %c0_1 = arith.constant 0 : index
    %c0_2 = arith.constant 0 : index
    %1 = vector.load %arg2[%c0_1, %c0_2] : memref<128x128xf32, #tpu.memory_space<vmem>>, vector<128x128xf32>
    %cst = arith.constant dense<0.000000e+00> : vector<8x128xf32>
    %2 = tpu.matmul %0, %1, %cst {dimension_numbers = #tpu.dot_dimension_numbers<[1], [0], [0], [1], [0, 0, 1, 1], [], []>, precision = #tpu.contract_precision<fp32>} : vector<8x128xf32>, vector<128x128xf32>, vector<8x128xf32> -> vector<8x128xf32>
    %c0_3 = arith.constant 0 : index
    %c0_4 = arith.constant 0 : index
    %3 = vector.load %arg3[%c0_3, %c0_4] : memref<1x128xf32, #tpu.memory_space<vmem>>, vector<1x128xf32>
    %4 = vector.broadcast %3 : vector<1x128xf32> to vector<8x128xf32>
    %5 = arith.addf %2, %4 : vector<8x128xf32>
    %6 = math.tanh %5 : vector<8x128xf32>
    %c0_5 = arith.constant 0 : index
    %c0_6 = arith.constant 0 : index
    %7 = vector.load %arg4[%c0_5, %c0_6] : memref<1x128xf32, #tpu.memory_space<vmem>>, vector<1x128xf32>
    %8 = vector.broadcast %7 : vector<1x128xf32> to vector<8x128xf32>
    %9 = arith.mulf %6, %8 : vector<8x128xf32>
    %cst_7 = arith.constant dense<0.000000e+00> : vector<8xf32>
    %10 = vector.multi_reduction <add>, %9, %cst_7 [1] : vector<8x128xf32> to vector<8xf32>
    %11 = vector.shape_cast %10 : vector<8xf32> to vector<8x1xf32>
    %c0_8 = arith.constant 0 : index
    %c0_9 = arith.constant 0 : index
    %12 = vector.load %arg5[%c0_8, %c0_9] : memref<1x1xf32, #tpu.memory_space<vmem>>, vector<1x1xf32>
    %13 = vector.broadcast %12 : vector<1x1xf32> to vector<8x1xf32>
    %14 = arith.addf %11, %13 : vector<8x1xf32>
    %c0_10 = arith.constant 0 : index
    %c0_11 = arith.constant 0 : index
    %15 = vector.load %arg6[%c0_10, %c0_11] : memref<8x1xf32, #tpu.memory_space<vmem>>, vector<8x1xf32>
    tpu.vector_store %arg6[%c0_10, %c0_11], %14 {strides = array<i32>} : memref<8x1xf32, #tpu.memory_space<vmem>>, vector<8x1xf32>,
    return
  }
  func.func @transform_0(%arg0: i32) -> (i32, i32) {
    %c0_i32 = arith.constant 0 : i32
    %c0_i32_0 = arith.constant 0 : i32
    return %arg0, %c0_i32 : i32, i32
  }
  func.func @transform_1(%arg0: i32) -> (i32, i32) {
    %c0_i32 = arith.constant 0 : i32
    %c0_i32_0 = arith.constant 0 : i32
    %c0_i32_1 = arith.constant 0 : i32
    return %c0_i32, %c0_i32_0 : i32, i32
  }
  func.func @transform_2(%arg0: i32) -> (i32, i32) {
    %c0_i32 = arith.constant 0 : i32
    %c0_i32_0 = arith.constant 0 : i32
    %c0_i32_1 = arith.constant 0 : i32
    return %c0_i32, %c0_i32_0 : i32, i32
  }
  func.func @transform_3(%arg0: i32) -> (i32, i32) {
    %c0_i32 = arith.constant 0 : i32
    %c0_i32_0 = arith.constant 0 : i32
    %c0_i32_1 = arith.constant 0 : i32
    return %c0_i32, %c0_i32_0 : i32, i32
  }
  func.func @transform_4(%arg0: i32) -> (i32, i32) {
    %c0_i32 = arith.constant 0 : i32
    %c0_i32_0 = arith.constant 0 : i32
    %c0_i32_1 = arith.constant 0 : i32
    return %c0_i32, %c0_i32_0 : i32, i32
  }
  func.func @transform_5(%arg0: i32) -> (i32, i32) {
    %c0_i32 = arith.constant 0 : i32
    %c0_i32_0 = arith.constant 0 : i32
    return %arg0, %c0_i32 : i32, i32
  }
}

</mosaic_0001>

<bundles_post_ra>
// kernel: tpu_custom_call.1
= control target key start
LH: loop header
LB: loop body
LE: loop exit
PB: predicated region body
PF: predicated region fallthrough
CT: control target
= control target key end

     0   :  { %s2091_s0 = inlined_call_operand.hbm [shape: f32[16,128], index: 0, kind: input, shape index: {}]   ;;  %s2092_s1 = inlined_call_operand.hbm [shape: f32[128,128], index: 1, kind: input, shape index: {}]   ;;  %s2093_s2 = inlined_call_operand.vmem [shape: f32[1,128], index: 2, kind: input, shape index: {}]   ;;  %s2094_s3 = inlined_call_operand.vmem [shape: f32[1,128], index: 3, kind: input, shape index: {}]   ;;  %s2095_s4 = inlined_call_operand.<no memory space> [shape: f32[1,1], index: 4, kind: input, shape index: {}]   ;;  %s2096_s5 = inlined_call_operand.vmem [shape: f32[16,1], index: 5, kind: output, shape index: {}]  }
   0x1   :  { %v10_v0 = vstv %s2095_s4 }
   0x2   :  { %11 = vst [vmem:[#allocation2] sm:$0x1] %v10_v0 }
   0x3   :  { %12 = vsyncpa [#allocation4], 0 }
   0x4   :  { %14 = vsyncpa [#allocation4 + $0x1], 0 }
   0x5   :  { %15 = vsyncpa [#allocation6], 0  ;;  %s1694_s20 = smov 0   ;;  %s1696_s21 = smov 0  }
   0x6   :  { %s1698_s22 = smov 0   ;;  %s1700_s23 = smov 0  }
   0x7 LB: > { %s1713_s4 = sadd.s32 4294967295, %s1652_s23   ;;  %p41_p0 = scmp.ne.s32.totalorder %s1644_s21, %s1640_s20  ;;  %s1652_s23 = sphi %s1700_s23, %s2111_s23   ;;  %s1648_s22 = sphi %s1698_s22, %s2110_s22   ;;  %s1644_s21 = sphi %s1696_s21, %s2109_s21   ;;  %s1640_s20 = sphi %s1694_s20, %s2108_s20  }
   0x8   : > { %p2097_p1 = scmp.eq.s32.totalorder %s1713_s4, 0  ;;  %p1019_p2 = scmp.ge.s32.totalorder %s1652_s23, 1 }
   0x9   : > { %p162_p3 = scmp.lt.s32.totalorder %s1652_s23, 3  ;;  %s1654_s26 = smov [#allocation5]  }
   0xa   : > { %p1721_p4 = por %p2097_p1, %p41_p0  ;;  %s174_s27 = sshll.u32 %s1654_s26, 4  ;;  %s175_s27 = int_to_ptr.vmem [resolvable:$true] %s174_s27 }
   0xb   : > { %p1725_p5 = pnand %p1019_p2, %p162_p3  ;;  %s1738_s29 = sadd.s32 1, %s1652_s23  }
   0xc   : > { %s2100_s24 = scalar_select %p1721_p4, 1, 0 }
   0xd   : > { %s2101_s25 = scalar_select %p1725_p5, 1, 0 }
   0xe   : > { %p1505_p6 = pneg %p1725_p5  ;;  %s28_s30 = sadd.s32 1, %s1648_s22 }
   0xf   : > { %s25_s6 = ssub.s32 %s1652_s23, %s1738_s29  ;;  %s1556_s9 = scalar_lea.hbm %s2092_s1, 2048 }
  0x10   : > { %p1733_p7 = pnand %p1505_p6, %p2097_p1  ;;  %p1557_p8 = scmp.ne.s32.totalorder %s2092_s1, %s1556_s9 }
  0x11   : > { %p1563_p12 = scmp.lt.u32.totalorder %s1556_s9, %s2092_s1 }
  0x12   : > { %p1558_p9 = pneg %p1733_p7 }
  0x14   : > { %p1559_p10 = pnand %p1558_p9, %p1557_p8 }
  0x16   : > { %p1560_p11 = pneg %p1559_p10 }
  0x18   : > { %p1565_p13 = pnand %p1563_p12, %p1560_p11 }
  0x1a   : > { %1568 = shalt.err (!%p1565_p13)
}
  0x1b   : > { %s1569_s14 = scalar_lea.vmem %s175_s27, 2048  ;;  %p1577_p6 = scmp.lt.s32.totalorder %s175_s27, %s175_s27 }
  0x1c   : > { %p1570_p0 = scmp.ne.s32.totalorder %s175_s27, %s1569_s14  ;;  %p1578_p1 = scmp.lt.s32.totalorder %s1569_s14, %s1569_s14 }
  0x1e   : > { %p1572_p2 = pnand %p1570_p0, %p1558_p9  ;;  %p1579_p4 = por %p1578_p1, %p1577_p6 }
  0x20   : > { %p1573_p3 = pneg %p1572_p2 }
  0x22   : > { %p1580_p5 = pnand %p1579_p4, %p1573_p3 }
  0x24   : > { %1583 = shalt.err (!%p1580_p5)
}
  0x25   : > { %s1655_s15 = smov 128   ;;  %s1656_s16 = smov 8  }
  0x26   : > { %1508 = dma.hbm_to_vmem [thread:$0]  (!%p1733_p7), %s2092_s1, 2048, %s175_s27, [#allocation6], %s1655_s15, %s1655_s15, %s1656_s16  }
  0x27   : > { %p26_p8 = scmp.eq.s32.totalorder %s25_s6, 0  ;;  %p35_p9 = scmp.ne.s32.totalorder %s1648_s22, %s1644_s21 }
  0x28   : > { %p36_p1 = scmp.eq.s32.totalorder %s1652_s23, 0  ;;  %p1514_p4 = scmp.lt.s32.totalorder %s1652_s23, 2 }
  0x29   : > { %s1764_s19 = scalar_select %p26_p8, %s1648_s22, %s28_s30  }
  0x2a   : > { %p37_p5 = por %p36_p1, %p35_p9  ;;  %s197_s20 = sand.u32 1, %s1648_s22  }
  0x2b   : > { %s1022_s26 = sshll.u32 %s197_s20, 3  ;;  %s1023_s7 = sshll.u32 %s1652_s23, 7 }
  0x2c   : > { %s1771_s10 = scalar_lea.hbm %s2091_s0, %s1023_s7  ;;  %s201_s27 = scalar_lea.vmem [#allocation3], %s1022_s26 }
  0x2d   : > { %s208_s28 = sshll.u32 %s201_s27, 4  ;;  %p1775_p7 = pnand %p1514_p4, %p37_p5  ;;  %s1773_s28 = int_to_ptr.vmem [resolvable:$true] %s208_s28 }
  0x2e   : > { %s198_s23 = scalar_lea.sflag [#allocation4], %s197_s20  ;;  %s1584_s6 = scalar_lea.hbm %s1771_s10, 128 }
  0x2f   : > { %p1585_p10 = scmp.ne.s32.totalorder %s1771_s10, %s1584_s6  ;;  %p1586_p11 = pneg %p1775_p7 }
  0x30   : > { %s1589_s13 = scalar_lea.hbm %s2091_s0, 256  ;;  %p1590_p0 = scmp.lt.u32.totalorder %s1771_s10, %s2091_s0 }
  0x31   : > { %p1587_p12 = pnand %p1586_p11, %p1585_p10  ;;  %p1591_p2 = scmp.lt.u32.totalorder %s1589_s13, %s1584_s6 }
  0x32   : > { %p1593_p6 = scmp.lt.u32.totalorder %s1584_s6, %s1771_s10 }
  0x33   : > { %p1588_p13 = pneg %p1587_p12  ;;  %p1592_p3 = por %p1591_p2, %p1590_p0 }
  0x35   : > { %p1594_p8 = por %p1593_p6, %p1592_p3 }
  0x37   : > { %p1595_p9 = pnand %p1594_p8, %p1588_p13 }
  0x39   : > { %1598 = shalt.err (!%p1595_p9)
}
  0x3a   : > { %s1599_s16 = scalar_lea.vmem %s1773_s28, 128  ;;  %s1657_s17 = smov [#allocation3]  }
  0x3b   : > { %p1600_p1 = scmp.ne.s32.totalorder %s1773_s28, %s1599_s16  ;;  %s1604_s18 = sshll.u32 %s1657_s17, 4  ;;  %s1605_s18 = int_to_ptr.vmem [resolvable:$false] %s1604_s18 }
  0x3c   : > { %s1606_s20 = scalar_lea.vmem %s1605_s18, 256  ;;  %p1607_p10 = scmp.lt.s32.totalorder %s1773_s28, %s1605_s18 }
  0x3d   : > { %p1602_p4 = pnand %p1600_p1, %p1586_p11  ;;  %p1608_p12 = scmp.lt.s32.totalorder %s1606_s20, %s1599_s16 }
  0x3f   : > { %p1603_p5 = pneg %p1602_p4  ;;  %p1609_p0 = por %p1608_p12, %p1607_p10 }
  0x41   : > { %p1610_p2 = pnand %p1609_p0, %p1603_p5 }
  0x43   : > { %1613 = shalt.err (!%p1610_p2)
}
  0x44   : > { %1512 = dma.hbm_to_vmem [thread:$0]  (!%p1775_p7), %s1771_s10, 128, %s1773_s28, %s198_s23  }
  0x45   : > { %p2104_p13 = scmp.ne.s32.totalorder %s2101_s25, 0 }
  0x46   : > { %s219_s26 = sand.u32 (!%p2104_p13), 1, %s1644_s21   ;;  %p2105_p11 = scmp.ne.s32.totalorder (!%p2104_p13), %s2100_s24, 0 }
  0x47   : > { %217 = sbr.rel (%p2104_p13) target bundleno = 556 (0x22c), region = 40  ;;  %s1807_s7 = sshll.u32 (!%p2104_p13), %s219_s26, 3 }
  0x48   : > { %s220_s8 = scalar_lea.sflag (!%p2104_p13), [#allocation4], %s219_s26  ;;  %s223_s9 = scalar_lea.vmem (!%p2104_p13), [#allocation3], %s1807_s7 }
  0x4e   : > { %1631 = dma.done.wait (%p2105_p11), %s220_s8, 128  }
  0x4f   : > { %1633 = vsyncadd (%p2105_p11), %s220_s8, 4294967168  ;;  %p2106_p3 = scmp.eq.s32.totalorder %s1713_s4, 0 }
  0x51   : > { %1635 = dma.done.wait (%p2106_p3), [#allocation6], 2048   ;;  %p2107_p7 = pmov %p2106_p3 }
  0x52   : > { %v1658_v1 = vmov 0.0|0.0   ;;  %vm1659_vm0 = vmmov 0   ;;  %v1660_v2 = vmov 0.0   ;;  %v258_v3 = vld [vmem:[#allocation5] sm:$0xff]  ;;  %v259_v4 = vld [vmem:[#allocation5 + $0x8] sm:$0xff]  ;;  %v260_v5 = vld [vmem:[#allocation5 + $0x10] sm:$0xff] }
  0x53   : > { %1637 = vsyncadd (%p2107_p7), [#allocation6], 4294965248  ;;  %1345 = vmatprep.subr.bf16.mxu1 %v1658_v1  ;;  %1417 = vmatprep.subr.bf16.mxu0 %v1658_v1  ;;  %v282_v6 = vand.u32 4294901760, %v258_v3  ;;  %v285_v7 = vand.u32 4294901760, %v259_v4  ;;  %v261_v8 = vld [vmem:[#allocation5 + $0x18] sm:$0xff]  ;;  %v288_v9 = vand.u32 4294901760, %v260_v5 }
  0x54   : > { %1167 = vmatprep.mubr.msk.f32.mxu1 %vm1659_vm0, %v1660_v2  ;;  %1272 = vmatprep.mubr.msk.f32.mxu0 %vm1659_vm0, %v1660_v2  ;;  %v291_v10 = vand.u32 4294901760, %v261_v8  ;;  %v262_v11 = vld [vmem:[#allocation5 + $0x20] sm:$0xff]  ;;  %v263_v12 = vld [vmem:[#allocation5 + $0x28] sm:$0xff]  ;;  %v264_v17 = vld [vmem:[#allocation5 + $0x30] sm:$0xff]  ;;  %p253_p6 = scmp.lt.s32.totalorder %s1713_s4, 1  ;;  %vm941_vm1 = vcmask 7168  }
  0x55   : > { %v1824_v13 = vpack.c.bf16 %v285_v7, %v282_v6  ;;  %v294_v15 = vand.u32 4294901760, %v262_v11  ;;  %v297_v16 = vand.u32 4294901760, %v263_v12  ;;  %v265_v18 = vld [vmem:[#allocation5 + $0x38] sm:$0xff]  ;;  %v300_v20 = vand.u32 4294901760, %v264_v17  ;;  %v1838_v22 = vld [vmem:[#allocation5 + $0x40] sm:$0xff]  ;;  %v1840_v23 = vld [vmem:[#allocation5 + $0x48] sm:$0xff] }
  0x56   : > { %v1828_v14 = vpack.c.bf16 %v291_v10, %v288_v9  ;;  %v303_v21 = vand.u32 4294901760, %v265_v18  ;;  %v306_v25 = vand.u32 4294901760, %v1838_v22  ;;  %v309_v26 = vand.u32 4294901760, %v1840_v23  ;;  %v257_v27 = vld [vmem:[%s223_s9] sm:$0xff]  ;;  %v1868_v36 = vld [vmem:[#allocation5 + $0x60] sm:$0xff]  ;;  %v1872_v37 = vld [vmem:[#allocation5 + $0x68] sm:$0xff] }
  0x57   : > { %1347 = vmatpush3.bf16.msra.mxu1 %v1824_v13  ;;  %1419 = vmatpush3.bf16.msra.mxu0 %v1824_v13  ;;  %v1834_v19 = vpack.c.bf16 %v297_v16, %v294_v15  ;;  %v1852_v28 = vld [vmem:[#allocation5 + $0x50] sm:$0xff]  ;;  %v1854_v29 = vld [vmem:[#allocation5 + $0x58] sm:$0xff]  ;;  %v1856_v30 = vsub.f32 %v258_v3, %v282_v6  ;;  %v1858_v31 = vand.u32 4294901760, %v257_v27  ;;  %v1860_v32 = vsub.f32 %v259_v4, %v285_v7  ;;  %s2113_s4 = smov (!%p253_p6, %s1713_s4), 1 }
  0x58   : > { %1348 = vmatprep.subr.bf16.mxu1 %v1658_v1  ;;  %1420 = vmatprep.subr.bf16.mxu0 %v1658_v1  ;;  %v1844_v24 = vpack.c.bf16 %v303_v21, %v300_v20  ;;  %v1864_v33 = vpack.c.bf16 %v309_v26, %v306_v25  ;;  %v312_v34 = vand.u32 4294901760, %v1852_v28  ;;  %v315_v35 = vand.u32 4294901760, %v1854_v29  ;;  %v1891_v44 = vld [vmem:[#allocation5 + $0x70] sm:$0xff]  ;;  %v1893_v45 = vld [vmem:[#allocation5 + $0x78] sm:$0xff]  ;;  %s1027_s28 = sshll.u32 %s2113_s4, 3 }
  0x59   : > { %v1874_v38 = vsub.f32 %v260_v5, %v288_v9  ;;  %v1876_v39 = vsub.f32 %v261_v8, %v291_v10  ;;  %v318_v40 = vand.u32 4294901760, %v1868_v36  ;;  %v1880_v41 = vsub.f32 %v257_v27, %v1858_v31  ;;  %s256_s6 = scalar_lea.vmem %s2096_s5, %s1027_s28 }
  0x5a   : > { %v1888_v42 = vpack.c.bf16 %v315_v35, %v312_v34  ;;  %v321_v43 = vand.u32 4294901760, %v1872_v37  ;;  %v375_v46 = vand.u32 4294901760, %v1856_v30  ;;  %v382_v47 = vand.u32 4294901760, %v1860_v32 }
  0x5b   : > { %1350 = vmatpush3.bf16.msra.mxu1 %v1828_v14  ;;  %1422 = vmatpush3.bf16.msra.mxu0 %v1828_v14  ;;  %v1899_v48 = vsub.f32 %v262_v11, %v294_v15  ;;  %v1901_v49 = vsub.f32 %v263_v12, %v297_v16  ;;  %v324_v50 = vand.u32 4294901760, %v1891_v44  ;;  %v327_v51 = vand.u32 4294901760, %v1893_v45 }
  0x5c   : > { %1351 = vmatprep.subr.bf16.mxu1 %v1658_v1  ;;  %1423 = vmatprep.subr.bf16.mxu0 %v1658_v1  ;;  %v364_v52 = vand.u32 4294901760, %v1880_v41  ;;  %v389_v53 = vand.u32 4294901760, %v1874_v38  ;;  %v1913_v54 = vpack.c.bf16 %v321_v43, %v318_v40  ;;  %v376_v55 = vsub.f32 %v1856_v30, %v375_v46 }
  0x5d   : > { %v383_v56 = vsub.f32 %v1860_v32, %v382_v47  ;;  %v396_v57 = vand.u32 4294901760, %v1876_v39  ;;  %v1920_v58 = vsub.f32 %v264_v17, %v300_v20  ;;  %v1922_v59 = vsub.f32 %v265_v18, %v303_v21 }
  0x5e   : > { %v365_v60 = vsub.f32 %v1880_v41, %v364_v52  ;;  %v390_v61 = vsub.f32 %v1874_v38, %v389_v53  ;;  %v403_v62 = vand.u32 4294901760, %v1899_v48  ;;  %v410_v63 = vand.u32 4294901760, %v1901_v49 }
  0x5f   : > { %1353 = vmatpush3.bf16.msra.mxu1 %v1834_v19  ;;  %1425 = vmatpush3.bf16.msra.mxu0 %v1834_v19  ;;  %v1934_v0 = vpack.c.bf16 %v327_v51, %v324_v50  ;;  %v377_v3 = vand.u32 4294901760, %v376_v55  ;;  %v384_v4 = vand.u32 4294901760, %v383_v56  ;;  %v397_v5 = vsub.f32 %v1876_v39, %v396_v57 }
  0x60   : > { %1354 = vmatprep.subr.bf16.mxu1 %v1658_v1  ;;  %1426 = vmatprep.subr.bf16.mxu0 %v1658_v1  ;;  %v1940_v6 = vsub.f32 %v1838_v22, %v306_v25  ;;  %v1943_v7 = vsub.f32 %v1840_v23, %v309_v26  ;;  %v1442_v8 = vpack.c.bf16 %v382_v47, %v375_v46  ;;  %v366_v9 = vand.u32 4294901760, %v365_v60 }
  0x61   : > { %v391_v10 = vand.u32 4294901760, %v390_v61  ;;  %v404_v11 = vsub.f32 %v1899_v48, %v403_v62  ;;  %v411_v12 = vsub.f32 %v1901_v49, %v410_v63  ;;  %v1370_v15 = vpack.c.bf16 %v384_v4, %v377_v3 }
  0x62   : > { %v398_v16 = vand.u32 4294901760, %v397_v5  ;;  %v417_v17 = vand.u32 4294901760, %v1920_v58  ;;  %v424_v18 = vand.u32 4294901760, %v1922_v59  ;;  %v1956_v20 = vsub.f32 %v1852_v28, %v312_v34 }
  0x63   : > { %1356 = vmatpush3.bf16.msra.mxu1 %v1844_v24  ;;  %1428 = vmatpush3.bf16.msra.mxu0 %v1844_v24  ;;  %v1961_v21 = vsub.f32 %v1854_v29, %v315_v35  ;;  %v1445_v22 = vpack.c.bf16 %v396_v57, %v389_v53  ;;  %v405_v23 = vand.u32 4294901760, %v404_v11  ;;  %v412_v25 = vand.u32 4294901760, %v411_v12 }
  0x64   : > { %1357 = vmatprep.subr.bf16.mxu1 %v1658_v1  ;;  %1429 = vmatprep.subr.bf16.mxu0 %v1658_v1  ;;  %v431_v26 = vand.u32 4294901760, %v1940_v6  ;;  %v1373_v27 = vpack.c.bf16 %v398_v16, %v391_v10  ;;  %v418_v46 = vsub.f32 %v1920_v58, %v417_v17  ;;  %v425_v28 = vsub.f32 %v1922_v59, %v424_v18 }
  0x65   : > { %v438_v34 = vand.u32 4294901760, %v1943_v7  ;;  %v1972_v29 = vsub.f32 %v1868_v36, %v318_v40  ;;  %v1977_v35 = vsub.f32 %v1872_v37, %v321_v43  ;;  %v1376_v47 = vpack.c.bf16 %v412_v25, %v405_v23 }
  0x66   : > { %v432_v53 = vsub.f32 %v1940_v6, %v431_v26  ;;  %v445_v55 = vand.u32 4294901760, %v1956_v20  ;;  %v419_v36 = vand.u32 4294901760, %v418_v46  ;;  %v426_v40 = vand.u32 4294901760, %v425_v28 }
  0x67   : > { %1359 = vmatpush3.bf16.msra.mxu1 %v1864_v33  ;;  %1431 = vmatpush3.bf16.msra.mxu0 %v1864_v33  ;;  %v439_v56 = vsub.f32 %v1943_v7, %v438_v34  ;;  %v452_v37 = vand.u32 4294901760, %v1961_v21  ;;  %v1992_v43 = vsub.f32 %v1891_v44, %v324_v50  ;;  %v1997_v57 = vsub.f32 %v1893_v45, %v327_v51 }
  0x68   : > { %1360 = vmatprep.subr.bf16.mxu1 %v1658_v1  ;;  %1432 = vmatprep.subr.bf16.mxu0 %v1658_v1  ;;  %v1451_v60 = vpack.c.bf16 %v424_v18, %v417_v17  ;;  %v433_v61 = vand.u32 4294901760, %v432_v53  ;;  %v1379_v3 = vpack.c.bf16 %v426_v40, %v419_v36  ;;  %v466_v44 = vand.u32 4294901760, %v1977_v35 }
  0x69   : > { %v440_v4 = vand.u32 4294901760, %v439_v56  ;;  %v453_v5 = vsub.f32 %v1961_v21, %v452_v37  ;;  %v1454_v45 = vpack.c.bf16 %v438_v34, %v431_v26  ;;  %v480_v12 = vand.u32 4294901760, %v1997_v57 }
  0x6a   : > { %v467_v11 = vsub.f32 %v1977_v35, %v466_v44 }
  0x6b   : > { %1362 = vmatpush3.bf16.msra.mxu1 %v1888_v42  ;;  %1434 = vmatpush3.bf16.msra.mxu0 %v1888_v42  ;;  %v454_v10 = vand.u32 4294901760, %v453_v5  ;;  %v481_v23 = vsub.f32 %v1997_v57, %v480_v12 }
  0x6c   : > { %1363 = vmatprep.subr.bf16.mxu1 %v1658_v1  ;;  %1435 = vmatprep.subr.bf16.mxu0 %v1658_v1  ;;  %v468_v18 = vand.u32 4294901760, %v467_v11 }
  0x6d   : > { %v482_v46 = vand.u32 4294901760, %v481_v23 }
  0x6f   : > { %1365 = vmatpush3.bf16.msra.mxu1 %v1913_v54  ;;  %1437 = vmatpush3.bf16.msra.mxu0 %v1913_v54 }
  0x70   : > { %1366 = vmatprep.subr.bf16.mxu1 %v1658_v1  ;;  %1438 = vmatprep.subr.bf16.mxu0 %v1658_v1 }
  0x73   : > { %1368 = vmatpush3.bf16.msra.mxu1 %v1934_v0  ;;  %1440 = vmatpush3.bf16.msra.mxu0 %v1934_v0 }
  0x74   : > { %1369 = vmatprep.subr.bf16.mxu1 %v1658_v1  ;;  %1441 = vmatprep.subr.bf16.mxu0 %v1658_v1 }
  0x76   : > { %1168 = vmatmul.mubr.f32.vlgmr.msra.gmra.mrb[0].mxu1 %v366_v9  ;;  %1273 = vmatmul.mubr.f32.vlgmr.msra.gmra.mrb[0].mxu0 %v364_v52  ;;  %v1448_v52 = vpack.c.bf16 %v410_v63, %v403_v62  ;;  %v446_v62 = vsub.f32 %v1956_v20, %v445_v55  ;;  %v459_v63 = vand.u32 4294901760, %v1972_v29  ;;  %v1382_v9 = vpack.c.bf16 %v440_v4, %v433_v61 }
  0x77   : > { %1371 = vmatpush3.bf16.msra.mxu1 %v1370_v15  ;;  %1443 = vmatpush3.bf16.msra.mxu0 %v1442_v8  ;;  %v473_v8 = vand.u32 4294901760, %v1992_v43  ;;  %v1457_v15 = vpack.c.bf16 %v452_v37, %v445_v55 }
  0x78   : > { %1372 = vmatprep.subr.bf16.mxu1 %v1658_v1  ;;  %1444 = vmatprep.subr.bf16.mxu0 %v1658_v1  ;;  %v447_v50 = vand.u32 4294901760, %v446_v62  ;;  %v460_v51 = vsub.f32 %v1972_v29, %v459_v63  ;;  %v1460_v26 = vpack.c.bf16 %v466_v44, %v459_v63 }
  0x79   : > { %1202 = vmatprep.mubr.msk.f32.mxu1 %vm1659_vm0, %v1660_v2  ;;  %1307 = vmatprep.mubr.msk.f32.mxu0 %vm1659_vm0, %v1660_v2  ;;  %v1463_v34 = vpack.c.bf16 %v480_v12, %v473_v8 }
  0x7a   : > { %v461_v16 = vand.u32 4294901760, %v460_v51  ;;  %v1385_v17 = vpack.c.bf16 %v454_v10, %v447_v50 }
  0x7b   : > { %1374 = vmatpush3.bf16.msra.mxu1 %v1373_v27  ;;  %1446 = vmatpush3.bf16.msra.mxu0 %v1445_v22  ;;  %v474_v22 = vsub.f32 %v1992_v43, %v473_v8 }
  0x7c   : > { %1375 = vmatprep.subr.bf16.mxu1 %v1658_v1  ;;  %1447 = vmatprep.subr.bf16.mxu0 %v1658_v1  ;;  %v1388_v25 = vpack.c.bf16 %v468_v18, %v461_v16 }
  0x7d   : > { %v475_v27 = vand.u32 4294901760, %v474_v22 }
  0x7f   : > { %1377 = vmatpush3.bf16.msra.mxu1 %v1376_v47  ;;  %1449 = vmatpush3.bf16.msra.mxu0 %v1448_v52  ;;  %v1391_v28 = vpack.c.bf16 %v482_v46, %v475_v27  ;;  %v1394_v47 = vpack.c.bf16 %v1860_v32, %v1856_v30  ;;  %v1397_v52 = vpack.c.bf16 %v1876_v39, %v1874_v38  ;;  %v1028_v32 = vld [vmem:[%s2093_s2] ss:$0 sm:$0xff] }
  0x80   : > { %1378 = vmatprep.subr.bf16.mxu1 %v1658_v1  ;;  %1450 = vmatprep.subr.bf16.mxu0 %v1658_v1  ;;  %v1400_v30 = vpack.c.bf16 %v1901_v49, %v1899_v48 }
  0x83   : > { %1380 = vmatpush3.bf16.msra.mxu1 %v1379_v3  ;;  %1452 = vmatpush3.bf16.msra.mxu0 %v1451_v60 }
  0x84   : > { %1381 = vmatprep.subr.bf16.mxu1 %v1658_v1  ;;  %1453 = vmatprep.subr.bf16.mxu0 %v1658_v1 }
  0x87   : > { %1383 = vmatpush3.bf16.msra.mxu1 %v1382_v9  ;;  %1455 = vmatpush3.bf16.msra.mxu0 %v1454_v45 }
  0x88   : > { %1384 = vmatprep.subr.bf16.mxu1 %v1658_v1  ;;  %1456 = vmatprep.subr.bf16.mxu0 %v1658_v1 }
  0x8b   : > { %1386 = vmatpush3.bf16.msra.mxu1 %v1385_v17  ;;  %1458 = vmatpush3.bf16.msra.mxu0 %v1457_v15 }
  0x8c   : > { %1387 = vmatprep.subr.bf16.mxu1 %v1658_v1  ;;  %1459 = vmatprep.subr.bf16.mxu0 %v1658_v1 }
  0x8f   : > { %1389 = vmatpush3.bf16.msra.mxu1 %v1388_v25  ;;  %1461 = vmatpush3.bf16.msra.mxu0 %v1460_v26 }
  0x90   : > { %1390 = vmatprep.subr.bf16.mxu1 %v1658_v1  ;;  %1462 = vmatprep.subr.bf16.mxu0 %v1658_v1 }
  0x93   : > { %1392 = vmatpush3.bf16.msra.mxu1 %v1391_v28  ;;  %1464 = vmatpush3.bf16.msra.mxu0 %v1463_v34 }
  0x94   : > { %1393 = vmatprep.subr.bf16.mxu1 %v1658_v1  ;;  %1465 = vmatprep.subr.bf16.mxu0 %v1658_v1 }
  0x96   : > { %1203 = vmatmul.mubr.f32.vlgmr.msra.gmra.mrb[0].mxu1 %v1858_v31  ;;  %1308 = vmatmul.mubr.f32.vlgmr.msra.gmra.mrb[0].mxu0 %v1858_v31 }
  0x97   : > { %1395 = vmatpush3.bf16.msra.mxu1 %v1394_v47  ;;  %1467 = vmatpush3.bf16.msra.mxu0 %v1824_v13  ;;  %v1403_v13 = vpack.c.bf16 %v1922_v59, %v1920_v58 }
  0x98   : > { %1396 = vmatprep.subr.bf16.mxu1 %v1658_v1  ;;  %1468 = vmatprep.subr.bf16.mxu0 %v1658_v1 }
  0x99   : > { %1237 = vmatprep.mubr.msk.f32.mxu1 %vm1659_vm0, %v1660_v2  ;;  %1342 = vmatprep.mubr.msk.f32.mxu0 %vm1659_vm0, %v1660_v2  ;;  %v1406_v2 = vpack.c.bf16 %v1943_v7, %v1940_v6 }
  0x9b   : > { %1398 = vmatpush3.bf16.msra.mxu1 %v1397_v52  ;;  %1470 = vmatpush3.bf16.msra.mxu0 %v1828_v14  ;;  %v1409_v14 = vpack.c.bf16 %v1961_v21, %v1956_v20 }
  0x9c   : > { %1399 = vmatprep.subr.bf16.mxu1 %v1658_v1  ;;  %1471 = vmatprep.subr.bf16.mxu0 %v1658_v1 }
  0x9f   : > { %1401 = vmatpush3.bf16.msra.mxu1 %v1400_v30  ;;  %1473 = vmatpush3.bf16.msra.mxu0 %v1834_v19  ;;  %v1412_v19 = vpack.c.bf16 %v1977_v35, %v1972_v29 }
  0xa0   : > { %1402 = vmatprep.subr.bf16.mxu1 %v1658_v1  ;;  %1474 = vmatprep.subr.bf16.mxu0 %v1658_v1 }
  0xa3   : > { %1404 = vmatpush3.bf16.msra.mxu1 %v1403_v13  ;;  %1476 = vmatpush3.bf16.msra.mxu0 %v1844_v24  ;;  %v1415_v24 = vpack.c.bf16 %v1997_v57, %v1992_v43 }
  0xa4   : > { %1405 = vmatprep.subr.bf16.mxu1 %v1658_v1  ;;  %1477 = vmatprep.subr.bf16.mxu0 %v1658_v1 }
  0xa7   : > { %1407 = vmatpush3.bf16.msra.mxu1 %v1406_v2  ;;  %1479 = vmatpush3.bf16.msra.mxu0 %v1864_v33 }
  0xa8   : > { %1408 = vmatprep.subr.bf16.mxu1 %v1658_v1  ;;  %1480 = vmatprep.subr.bf16.mxu0 %v1658_v1 }
  0xab   : > { %1410 = vmatpush3.bf16.msra.mxu1 %v1409_v14  ;;  %1482 = vmatpush3.bf16.msra.mxu0 %v1888_v42 }
  0xac   : > { %1411 = vmatprep.subr.bf16.mxu1 %v1658_v1  ;;  %1483 = vmatprep.subr.bf16.mxu0 %v1658_v1 }
  0xaf   : > { %1413 = vmatpush3.bf16.msra.mxu1 %v1412_v19  ;;  %1485 = vmatpush3.bf16.msra.mxu0 %v1913_v54 }
  0xb0   : > { %1414 = vmatprep.subr.bf16.mxu1 %v1658_v1  ;;  %1486 = vmatprep.subr.bf16.mxu0 %v1658_v1  ;;  %v1029_v1 = vld [vmem:[%s2094_s3] ss:$0 sm:$0xff] }
  0xb3   : > { %1416 = vmatpush3.bf16.msra.mxu1 %v1415_v24  ;;  %1488 = vmatpush3.bf16.msra.mxu0 %v1934_v0 }
  0xb6   : > { %1238 = vmatmul.mubr.f32.vlgmr.msra.gmra.mrb[0].mxu1 %v1880_v41  ;;  %1343 = vmatmul.mubr.f32.vlgmr.msra.gmra.mrb[0].mxu0 %v1858_v31  ;;  %v1030_v31 = vld [vmem:[#allocation2] ss:$0 sm:$0xff] }
 0x189   : > { %v623_v33 = vpop.f32.mrb[0].mxu1  ;;  %v918_v38 = vpop.f32.mrb[0].mxu0 }
 0x18a   : > { %v1489_v39 = vadd.f32 %v1028_v32, %v623_v33  ;;  %v1239_v42 = vpop.f32.mrb[1].mxu1  ;;  %v1344_v48 = vpop.f32.mrb[1].mxu0 }
 0x18c   : > { %v1490_v49 = vadd.f32 %v1489_v39, %v918_v38 }
 0x18e   : > { %1554 = vtanh.f32 %v1490_v49 }
 0x198   : > { %v1555_v54 = vpop.eup %1554 }
 0x199   : > { %v930_v58 = vmul.f32 %v1555_v54, %v1029_v1 }
 0x19b   : > { %931 = vadd.xlane.f32.xlu0 %v930_v58 }
 0x228   : > { %v932_v41 = vpop.xlane.xlu0 %931 }
 0x229   : > { %v940_v59 = vadd.f32 %v1030_v31, %v932_v41 }
 0x22b   : > { %942 = vst.msk [vmem:[%s256_s6] sm:$0xff] %vm941_vm1, %v940_v59 }
 0x22c PF: > { %p18_p8 = scmp.ge.s32.totalorder %s1738_s29, 4   ;;  %s2108_s20 = smov %s1644_s21 }
 0x22d   : > { %s2109_s21 = smov %s1648_s22  ;;  %s2110_s22 = smov %s1764_s19 }
 0x22e   : > { %s2111_s23 = smov %s1738_s29  ;;  %20 = sbr.rel (!%p18_p8) target bundleno = 7 (0x7), region = 84 }
 0x235   :  { %962 = vsyncpa [#allocation4], 1 }
 0x236   :  { %964 = vsyncpa [#allocation4 + $0x1], 1 }
 0x237   :  { %965 = vsyncpa [#allocation6], 1 }

</bundles_post_ra>
